<compile_context>
chip_gen: v7x
topology: tpu7x:2x2x1
jax: 0.10.0
libtpu: 0.0.40
codegen_flags: <defaults>
</compile_context>

<pallas_src>
import jax
import jax.numpy as jnp
from jax.experimental import pallas as pl
from jax.experimental.pallas import tpu as pltpu


def _neighbors(x, axis):
    """Clamped-index neighbors of a 2D array along `axis`.

    Returns (prev, nxt) with prev[i] = x[max(i-1, 0)], nxt[i] = x[min(i+1, n-1)].
    Duplicating the edge element is equivalent to F.max_pool2d's implicit -inf
    padding for the max path (and +inf for the min path) of a 3-tap window.
    """
    n = x.shape[axis]

    def slc(lo, hi):
        idx = [slice(None)] * x.ndim
        idx[axis] = slice(lo, hi)
        return x[tuple(idx)]

    prev = jnp.concatenate([slc(0, 1), slc(0, n - 1)], axis=axis)
    nxt = jnp.concatenate([slc(1, n), slc(n - 1, n)], axis=axis)
    return prev, nxt


def _dilate_erode_3x3(m):
    """Fused separable 3x3 max-pool (dilation) and min-pool (erosion), 2D input."""
    up, down = _neighbors(m, 0)                       # sublane shifts (shared by max & min)
    mx = jnp.maximum(jnp.maximum(up, m), down)        # column-wise 3-tap max
    mn = jnp.minimum(jnp.minimum(up, m), down)        # column-wise 3-tap min
    l_mx, r_mx = _neighbors(mx, 1)                    # lane shifts
    l_mn, r_mn = _neighbors(mn, 1)
    dilated = jnp.maximum(jnp.maximum(l_mx, mx), r_mx)
    eroded = jnp.minimum(jnp.minimum(l_mn, mn), r_mn)
    return dilated, eroded


def boundary_loss_kernel(pred_ref, target_ref, mask_ref, partial_ref):
    # One image per grid step.
    m = mask_ref[0, 0].astype(jnp.float32)            # (H, W)
    dilated, eroded = _dilate_erode_3x3(m)
    boundary = jnp.clip(dilated - eroded, 0.0, 1.0)   # (H, W)

    # |pred - target| in native dtype (bf16 VPU path on v6e/v7x), f32 accumulate.
    diff = jnp.abs(pred_ref[0] - target_ref[0])              # (C, H, W)
    diff_hw = jnp.sum(diff.astype(jnp.float32), axis=0)      # (H, W)

    num = jnp.sum(diff_hw * boundary)                 # scalar partials for this image
    den = jnp.sum(boundary)

    # Lane-dense partial output tile: sublane 0 = num, sublane 1 = den, rest 0.
    sub = jax.lax.broadcasted_iota(jnp.int32, (8, 128), 0)
    partial_ref[0] = jnp.where(sub == 0, num, jnp.where(sub == 1, den, 0.0))


def boundary_aware_loss(pred, target, mask, *, epsilon=1e-6):
    """Pallas implementation of BoundaryAwareLoss.forward (kernel_size=3 path).

    Note: `boundary_width` from __init__ only affects extract_boundary(); the
    forward() pass hard-codes kernel_size=3, which is what is implemented here.
    The Sobel buffers from __init__ are unused by forward() and omitted.
    """
    n, c, h, w = pred.shape
    assert target.shape == pred.shape and mask.shape == (n, 1, h, w)

    itemsize = pred.dtype.itemsize
    bytes_accessed = (2 * c * itemsize + mask.dtype.itemsize) * n * h * w + n * 8 * 128 * 4
    flops = 4 * n * c * h * w + 16 * n * h * w

    partials = pl.pallas_call(
        boundary_loss_kernel,
        out_shape=jax.ShapeDtypeStruct((n, 8, 128), jnp.float32),
        grid=(n,),
        in_specs=[
            pl.BlockSpec((1, c, h, w), lambda i: (i, 0, 0, 0)),
            pl.BlockSpec((1, c, h, w), lambda i: (i, 0, 0, 0)),
            pl.BlockSpec((1, 1, h, w), lambda i: (i, 0, 0, 0)),
        ],
        out_specs=pl.BlockSpec((1, 8, 128), lambda i: (i, 0, 0)),
        compiler_params=pltpu.CompilerParams(
            dimension_semantics=("parallel",)),
        cost_estimate=pl.CostEstimate(
            flops=flops, transcendentals=0, bytes_accessed=bytes_accessed),
    )(pred, target, mask)

    num = jnp.sum(partials[:, 0, 0])
    den = jnp.sum(partials[:, 1, 0])

    loss = num / (den + jnp.asarray(epsilon, jnp.float32))
    loss = jnp.where(den < 1.0, 0.0, loss)                       # boundary.sum() < 1 -> 0
    loss = jnp.where(jnp.isnan(loss) | jnp.isinf(loss), 0.0, loss)
    return loss.astype(jnp.float32)


def _reference(pred, target, mask, epsilon=1e-6):
    """Pure-JAX reference of the PyTorch forward pass (for validation)."""
    pads = [(0, 0), (0, 0), (1, 1), (1, 1)]
    dilated = jax.lax.reduce_window(mask, -jnp.inf, jax.lax.max,
                                    (1, 1, 3, 3), (1, 1, 1, 1), pads)
    eroded = -jax.lax.reduce_window(-mask, -jnp.inf, jax.lax.max,
                                    (1, 1, 3, 3), (1, 1, 1, 1), pads)
    boundary = jnp.clip(dilated - eroded, 0.0, 1.0)
    num = jnp.sum(jnp.abs(pred - target) * boundary)
    den = jnp.sum(boundary)
    loss = jnp.where(den < 1.0, 0.0, num / (den + epsilon))
    return loss.astype(jnp.float32)


if __name__ == "__main__":
    key = jax.random.PRNGKey(0)
    kp, kt = jax.random.split(key)
    N, C, H, W = 2, 4, 16, 16
    pred = jax.random.normal(kp, (N, C, H, W), dtype=jnp.float32)
    target = jax.random.normal(kt, (N, C, H, W), dtype=jnp.float32)
    # Binary mask: 1 = preserved region (central square), 0 = region to inpaint.
    mask = jnp.zeros((N, 1, H, W), dtype=jnp.float32)
    mask = mask.at[:, :, 4:12, 4:12].set(1.0)

    loss = jax.block_until_ready(boundary_aware_loss(pred, target, mask))
    ref = _reference(pred, target, mask)
    assert jnp.allclose(loss, ref, rtol=1e-5, atol=1e-5), (loss, ref)
    print("KERNEL_OK")
</pallas_src>

<mosaic_0001>
module attributes {stable_mosaic.version = 11 : i64} {
  func.func @boundary_loss_kernel(%arg0: i32, %arg1: memref<1x4x16x16xf32, #tpu.memory_space<vmem>>, %arg2: memref<1x4x16x16xf32, #tpu.memory_space<vmem>>, %arg3: memref<1x1x16x16xf32, #tpu.memory_space<vmem>>, %arg4: memref<1x8x128xf32, #tpu.memory_space<vmem>>) attributes {dimension_semantics = [#tpu.dimension_semantics<parallel>], iteration_bounds = array<i64: 2>, scalar_prefetch = 0 : i64, scratch_operands = 0 : i64, tpu.core_type = #tpu.core_type<tc>, window_params = [{transform_indices = @transform_0, window_bounds = array<i64: 1, 4, 16, 16>}, {transform_indices = @transform_1, window_bounds = array<i64: 1, 4, 16, 16>}, {transform_indices = @transform_2, window_bounds = array<i64: 1, 1, 16, 16>}, {transform_indices = @transform_3, window_bounds = array<i64: 1, 8, 128>}]} {
    %c0 = arith.constant 0 : index
    %c0_0 = arith.constant 0 : index
    %c0_1 = arith.constant 0 : index
    %c0_2 = arith.constant 0 : index
    %0 = vector.load %arg3[%c0, %c0_0, %c0_1, %c0_2] : memref<1x1x16x16xf32, #tpu.memory_space<vmem>>, vector<1x1x16x16xf32>
    %1 = vector.shape_cast %0 : vector<1x1x16x16xf32> to vector<16x16xf32>
    %2 = vector.extract_strided_slice %1 {offsets = [0, 0], sizes = [1, 16], strides = [1, 1]} : vector<16x16xf32> to vector<1x16xf32>
    %3 = vector.extract_strided_slice %1 {offsets = [0, 0], sizes = [15, 16], strides = [1, 1]} : vector<16x16xf32> to vector<15x16xf32>
    %4 = tpu.concatenate %2, %3 in 0 : vector<1x16xf32>, vector<15x16xf32> -> vector<16x16xf32>
    %5 = vector.extract_strided_slice %1 {offsets = [1, 0], sizes = [15, 16], strides = [1, 1]} : vector<16x16xf32> to vector<15x16xf32>
    %6 = vector.extract_strided_slice %1 {offsets = [15, 0], sizes = [1, 16], strides = [1, 1]} : vector<16x16xf32> to vector<1x16xf32>
    %7 = tpu.concatenate %5, %6 in 0 : vector<15x16xf32>, vector<1x16xf32> -> vector<16x16xf32>
    %8 = arith.maximumf %4, %1 : vector<16x16xf32>
    %9 = arith.maximumf %8, %7 : vector<16x16xf32>
    %10 = arith.minimumf %4, %1 : vector<16x16xf32>
    %11 = arith.minimumf %10, %7 : vector<16x16xf32>
    %12 = vector.extract_strided_slice %9 {offsets = [0, 0], sizes = [16, 1], strides = [1, 1]} : vector<16x16xf32> to vector<16x1xf32>
    %13 = vector.extract_strided_slice %9 {offsets = [0, 0], sizes = [16, 15], strides = [1, 1]} : vector<16x16xf32> to vector<16x15xf32>
    %14 = tpu.concatenate %12, %13 in 1 : vector<16x1xf32>, vector<16x15xf32> -> vector<16x16xf32>
    %15 = vector.extract_strided_slice %9 {offsets = [0, 1], sizes = [16, 15], strides = [1, 1]} : vector<16x16xf32> to vector<16x15xf32>
    %16 = vector.extract_strided_slice %9 {offsets = [0, 15], sizes = [16, 1], strides = [1, 1]} : vector<16x16xf32> to vector<16x1xf32>
    %17 = tpu.concatenate %15, %16 in 1 : vector<16x15xf32>, vector<16x1xf32> -> vector<16x16xf32>
    %18 = vector.extract_strided_slice %11 {offsets = [0, 0], sizes = [16, 1], strides = [1, 1]} : vector<16x16xf32> to vector<16x1xf32>
    %19 = vector.extract_strided_slice %11 {offsets = [0, 0], sizes = [16, 15], strides = [1, 1]} : vector<16x16xf32> to vector<16x15xf32>
    %20 = tpu.concatenate %18, %19 in 1 : vector<16x1xf32>, vector<16x15xf32> -> vector<16x16xf32>
    %21 = vector.extract_strided_slice %11 {offsets = [0, 1], sizes = [16, 15], strides = [1, 1]} : vector<16x16xf32> to vector<16x15xf32>
    %22 = vector.extract_strided_slice %11 {offsets = [0, 15], sizes = [16, 1], strides = [1, 1]} : vector<16x16xf32> to vector<16x1xf32>
    %23 = tpu.concatenate %21, %22 in 1 : vector<16x15xf32>, vector<16x1xf32> -> vector<16x16xf32>
    %24 = arith.maximumf %14, %9 : vector<16x16xf32>
    %25 = arith.maximumf %24, %17 : vector<16x16xf32>
    %26 = arith.minimumf %20, %11 : vector<16x16xf32>
    %27 = arith.minimumf %26, %23 : vector<16x16xf32>
    %28 = arith.subf %25, %27 : vector<16x16xf32>
    %cst = arith.constant 0.000000e+00 : f32
    %cst_3 = arith.constant 1.000000e+00 : f32
    %29 = vector.broadcast %cst : f32 to vector<16x16xf32>
    %30 = arith.maximumf %29, %28 : vector<16x16xf32>
    %31 = vector.broadcast %cst_3 : f32 to vector<16x16xf32>
    %32 = arith.minimumf %31, %30 : vector<16x16xf32>
    %c0_4 = arith.constant 0 : index
    %c0_5 = arith.constant 0 : index
    %c0_6 = arith.constant 0 : index
    %c0_7 = arith.constant 0 : index
    %33 = vector.load %arg1[%c0_4, %c0_5, %c0_6, %c0_7] : memref<1x4x16x16xf32, #tpu.memory_space<vmem>>, vector<1x4x16x16xf32>
    %34 = vector.shape_cast %33 : vector<1x4x16x16xf32> to vector<4x16x16xf32>
    %c0_8 = arith.constant 0 : index
    %c0_9 = arith.constant 0 : index
    %c0_10 = arith.constant 0 : index
    %c0_11 = arith.constant 0 : index
    %35 = vector.load %arg2[%c0_8, %c0_9, %c0_10, %c0_11] : memref<1x4x16x16xf32, #tpu.memory_space<vmem>>, vector<1x4x16x16xf32>
    %36 = vector.shape_cast %35 : vector<1x4x16x16xf32> to vector<4x16x16xf32>
    %37 = arith.subf %34, %36 : vector<4x16x16xf32>
    %38 = math.absf %37 : vector<4x16x16xf32>
    %cst_12 = arith.constant dense<0.000000e+00> : vector<16x16xf32>
    %39 = vector.multi_reduction <add>, %38, %cst_12 [0] : vector<4x16x16xf32> to vector<16x16xf32>
    %40 = arith.mulf %39, %32 : vector<16x16xf32>
    %41 = vector.shape_cast %40 : vector<16x16xf32> to vector<1x16x16xf32>
    %cst_13 = arith.constant dense<0.000000e+00> : vector<1xf32>
    %42 = vector.multi_reduction <add>, %41, %cst_13 [1, 2] : vector<1x16x16xf32> to vector<1xf32>
    %43 = vector.shape_cast %42 : vector<1xf32> to vector<1x1x1xf32>
    %44 = vector.extract %43[0, 0, 0] : f32 from vector<1x1x1xf32>
    %45 = vector.shape_cast %32 : vector<16x16xf32> to vector<1x16x16xf32>
    %cst_14 = arith.constant dense<0.000000e+00> : vector<1xf32>
    %46 = vector.multi_reduction <add>, %45, %cst_14 [1, 2] : vector<1x16x16xf32> to vector<1xf32>
    %47 = vector.shape_cast %46 : vector<1xf32> to vector<1x1x1xf32>
    %48 = vector.extract %47[0, 0, 0] : f32 from vector<1x1x1xf32>
    %49 = tpu.iota {dimensions = array<i32: 0>} : vector<8x128xi32>
    %c0_i32 = arith.constant 0 : i32
    %50 = vector.broadcast %c0_i32 : i32 to vector<8x128xi32>
    %51 = arith.cmpi eq, %49, %50 : vector<8x128xi32>
    %c1_i32 = arith.constant 1 : i32
    %52 = vector.broadcast %c1_i32 : i32 to vector<8x128xi32>
    %53 = arith.cmpi eq, %49, %52 : vector<8x128xi32>
    %cst_15 = arith.constant 0.000000e+00 : f32
    %54 = vector.broadcast %48 : f32 to vector<8x128xf32>
    %55 = vector.broadcast %cst_15 : f32 to vector<8x128xf32>
    %56 = arith.select %53, %54, %55 : vector<8x128xi1>, vector<8x128xf32>
    %57 = vector.broadcast %44 : f32 to vector<8x128xf32>
    %58 = arith.select %51, %57, %56 : vector<8x128xi1>, vector<8x128xf32>
    %c0_16 = arith.constant 0 : index
    %c0_17 = arith.constant 0 : index
    %c0_18 = arith.constant 0 : index
    %59 = vector.load %arg4[%c0_16, %c0_17, %c0_18] : memref<1x8x128xf32, #tpu.memory_space<vmem>>, vector<1x8x128xf32>
    %60 = vector.shape_cast %59 : vector<1x8x128xf32> to vector<8x128xf32>
    %61 = vector.shape_cast %58 : vector<8x128xf32> to vector<1x8x128xf32>
    tpu.vector_store %arg4[%c0_16, %c0_17, %c0_18], %61 {strides = array<i32>} : memref<1x8x128xf32, #tpu.memory_space<vmem>>, vector<1x8x128xf32>,
    return
  }
  func.func @transform_0(%arg0: i32) -> (i32, i32, i32, i32) {
    %c0_i32 = arith.constant 0 : i32
    %c0_i32_0 = arith.constant 0 : i32
    %c0_i32_1 = arith.constant 0 : i32
    %c0_i32_2 = arith.constant 0 : i32
    return %arg0, %c0_i32, %c0_i32_0, %c0_i32_1 : i32, i32, i32, i32
  }
  func.func @transform_1(%arg0: i32) -> (i32, i32, i32, i32) {
    %c0_i32 = arith.constant 0 : i32
    %c0_i32_0 = arith.constant 0 : i32
    %c0_i32_1 = arith.constant 0 : i32
    %c0_i32_2 = arith.constant 0 : i32
    return %arg0, %c0_i32, %c0_i32_0, %c0_i32_1 : i32, i32, i32, i32
  }
  func.func @transform_2(%arg0: i32) -> (i32, i32, i32, i32) {
    %c0_i32 = arith.constant 0 : i32
    %c0_i32_0 = arith.constant 0 : i32
    %c0_i32_1 = arith.constant 0 : i32
    %c0_i32_2 = arith.constant 0 : i32
    return %arg0, %c0_i32, %c0_i32_0, %c0_i32_1 : i32, i32, i32, i32
  }
  func.func @transform_3(%arg0: i32) -> (i32, i32, i32) {
    %c0_i32 = arith.constant 0 : i32
    %c0_i32_0 = arith.constant 0 : i32
    %c0_i32_1 = arith.constant 0 : i32
    return %arg0, %c0_i32, %c0_i32_0 : i32, i32, i32
  }
}

</mosaic_0001>

<bundles_post_ra>
// kernel: tpu_custom_call.1
= control target key start
LH: loop header
LB: loop body
LE: loop exit
PB: predicated region body
PF: predicated region fallthrough
CT: control target
= control target key end

     0   :  { %s1151_s0 = inlined_call_operand.hbm [shape: f32[2,4,16,16], index: 0, kind: input, shape index: {}]   ;;  %s1152_s1 = inlined_call_operand.hbm [shape: f32[2,4,16,16], index: 1, kind: input, shape index: {}]   ;;  %s1153_s2 = inlined_call_operand.hbm [shape: f32[2,1,16,16], index: 2, kind: input, shape index: {}]   ;;  %s1154_s3 = inlined_call_operand.hbm [shape: f32[2,8,128], index: 3, kind: output, shape index: {}]  }
   0x1   :  { %1161 = sst [smem:[#allocation12_spill]] %s1151_s0 }
   0x2   :  { %8 = vsyncpa [#allocation3], 0 }
   0x3   :  { %10 = vsyncpa [#allocation3 + $0x1], 0 }
   0x4   :  { %11 = vsyncpa [#allocation6], 0 }
   0x5   :  { %13 = vsyncpa [#allocation6 + $0x1], 0 }
   0x6   :  { %14 = vsyncpa [#allocation4], 0 }
   0x7   :  { %16 = vsyncpa [#allocation4 + $0x1], 0  ;;  %s831_s12 = smov 0   ;;  %s833_s13 = smov 0  }
   0x8   :  { %s835_s14 = smov 0   ;;  %s837_s15 = smov 0  }
   0x9 LB: > { %s852_s16 = sadd.s32 4294967295, %s801_s15   ;;  %s553_s17 = sadd.s32 4294967294, %s801_s15   ;;  %s801_s15 = sphi %s837_s15, %s1180_s15   ;;  %s797_s14 = sphi %s835_s14, %s1179_s14   ;;  %s793_s13 = sphi %s833_s13, %s1178_s13   ;;  %s789_s12 = sphi %s831_s12, %s1177_s12  }
   0xa   : > { %s856_s18 = sadd.s32 1, %s801_s15   ;;  %s29_s19 = sadd.s32 1, %s797_s14 }
   0xb   : > { %s26_s20 = ssub.s32 %s801_s15, %s856_s18  ;;  %p36_p0 = scmp.ne.s32.totalorder %s797_s14, %s793_s13 }
   0xc   : > { %p27_p1 = scmp.eq.s32.totalorder %s26_s20, 0  ;;  %p37_p2 = scmp.eq.s32.totalorder %s801_s15, 0 }
   0xd   : > { %p42_p3 = scmp.ne.s32.totalorder %s793_s13, %s789_s12  ;;  %p43_p4 = scmp.eq.s32.totalorder %s852_s16, 0 }
   0xe   : > { %s868_s21 = scalar_select %p27_p1, %s797_s14, %s29_s19  }
   0xf   : > { %p38_p5 = por %p37_p2, %p36_p0  ;;  %p870_p6 = por %p43_p4, %p42_p3 }
  0x10   : > { %p118_p7 = scmp.eq.s32.totalorder %s852_s16, 1  ;;  %p124_p8 = scmp.eq.s32.totalorder %s553_s17, 1 }
  0x11   : > { %s1162_s22 = scalar_select %p870_p6, 1, 0 }
  0x12   : > { %p603_p10 = scmp.lt.s32.totalorder %s801_s15, 2  ;;  %p877_p11 = por %p118_p7, %p36_p0 }
  0x13   : > { %p881_p12 = por %p124_p8, %p42_p3  ;;  %s886_s25 = sand.u32 1, %s797_s14  }
  0x14   : > { %s1163_s23 = scalar_select %p877_p11, 1, 0 }
  0x15   : > { %s1164_s24 = scalar_select %p881_p12, 1, 0 }
  0x16   : > { %s574_s26 = sshll.u32 %s801_s15, 10  ;;  %s556_s27 = sshll.u32 %s886_s25, 6 }
  0x17   : > { %p890_p13 = pnand %p603_p10, %p38_p5  ;;  %s165_s29 = sand.u32 1, %s801_s15  }
  0x18   : > { %s900_s5 = scalar_lea.hbm %s1152_s1, %s574_s26  ;;  %s169_s6 = scalar_lea.vmem [#allocation5], %s556_s27 }
  0x19   : > { %s176_s7 = sshll.u32 %s169_s6, 4  ;;  %s907_s8 = scalar_lea.sflag [#allocation6], %s165_s29  ;;  %s904_s7 = int_to_ptr.vmem [resolvable:$true] %s176_s7 }
  0x1a   : > { %s641_s9 = scalar_lea.hbm %s900_s5, 1024  ;;  %p913_p2 = pneg %p890_p13 }
  0x1b   : > { %p642_p1 = scmp.ne.s32.totalorder %s900_s5, %s641_s9  ;;  %s646_s19 = scalar_lea.hbm %s1152_s1, 2048 }
  0x1c   : > { %p647_p5 = scmp.lt.u32.totalorder %s900_s5, %s1152_s1  ;;  %p648_p7 = scmp.lt.u32.totalorder %s646_s19, %s641_s9 }
  0x1d   : > { %p644_p3 = pnand %p913_p2, %p642_p1  ;;  %p650_p10 = scmp.lt.u32.totalorder %s641_s9, %s900_s5 }
  0x1e   : > { %p649_p8 = por %p648_p7, %p647_p5 }
  0x1f   : > { %p645_p4 = pneg %p644_p3 }
  0x20   : > { %p651_p9 = por %p650_p10, %p649_p8 }
  0x22   : > { %p652_p0 = pnand %p651_p9, %p645_p4 }
  0x24   : > { %655 = shalt.err (!%p652_p0)
}
  0x25   : > { %s656_s29 = scalar_lea.vmem %s904_s7, 1024  ;;  %s803_s4 = smov [#allocation5]  }
  0x26   : > { %p657_p1 = scmp.ne.s32.totalorder %s904_s7, %s656_s29  ;;  %s661_s6 = sshll.u32 %s803_s4, 4  ;;  %s662_s6 = int_to_ptr.vmem [resolvable:$false] %s661_s6 }
  0x27   : > { %s663_s11 = scalar_lea.vmem %s662_s6, 2048  ;;  %p664_p11 = scmp.lt.s32.totalorder %s904_s7, %s662_s6 }
  0x28   : > { %p659_p3 = pnand %p657_p1, %p913_p2  ;;  %p665_p6 = scmp.lt.s32.totalorder %s663_s11, %s656_s29 }
  0x2a   : > { %p660_p12 = pneg %p659_p3  ;;  %p666_p5 = por %p665_p6, %p664_p11 }
  0x2c   : > { %p667_p7 = pnand %p666_p5, %p660_p12 }
  0x2e   : > { %670 = shalt.err (!%p667_p7)
}
  0x2f   : > { %s1157_s9 = smov 128   ;;  %s1159_s17 = smov 8  }
  0x30   : > { %595 = dma.hbm_to_vmem [thread:$0]  (!%p890_p13), %s900_s5, 1024, %s904_s7, %s907_s8, %s1157_s9, %s1157_s9, %s1159_s17  }
  0x31   : > { %p205_p6 = scmp.lt.s32.totalorder %s801_s15, 3  ;;  %s1167_s0 = sld [smem:[#allocation12_spill]] }
  0x32   : > { %p1168_p9 = scmp.ge.s32.totalorder %s801_s15, 1  ;;  %s148_s4 = scalar_lea.vmem [#allocation2], %s556_s27 }
  0x33   : > { %s155_s6 = sshll.u32 %s148_s4, 4  ;;  %s562_s5 = sshll.u32 %s886_s25, 4  ;;  %s956_s6 = int_to_ptr.vmem [resolvable:$true] %s155_s6 }
  0x34   : > { %p950_p11 = pnand %p1168_p9, %p205_p6  ;;  %s145_s7 = scalar_lea.sflag [#allocation3], %s886_s25 }
  0x36   : > { %s1169_s29 = scalar_select %p950_p11, 1, 0 }
  0x37   : > { %s946_s30 = scalar_lea.hbm %s1167_s0, %s574_s26  ;;  %s676_s20 = scalar_lea.hbm %s1167_s0, 2048 }
  0x38   : > { %s671_s11 = scalar_lea.hbm %s946_s30, 1024  ;;  %p677_p8 = scmp.lt.u32.totalorder %s946_s30, %s1167_s0 }
  0x39   : > { %p672_p12 = scmp.ne.s32.totalorder %s946_s30, %s671_s11  ;;  %p678_p10 = scmp.lt.u32.totalorder %s676_s20, %s671_s11 }
  0x3a   : > { %p680_p3 = scmp.lt.u32.totalorder %s671_s11, %s946_s30 }
  0x3b   : > { %p674_p0 = pnand %p672_p12, %p913_p2  ;;  %p679_p1 = por %p678_p10, %p677_p8 }
  0x3d   : > { %p675_p4 = pneg %p674_p0  ;;  %p681_p5 = por %p680_p3, %p679_p1 }
  0x3f   : > { %p682_p7 = pnand %p681_p5, %p675_p4 }
  0x41   : > { %685 = shalt.err (!%p682_p7)
}
  0x42   : > { %s686_s27 = scalar_lea.vmem %s956_s6, 1024  ;;  %s806_s4 = smov [#allocation2]  }
  0x43   : > { %p687_p6 = scmp.ne.s32.totalorder %s956_s6, %s686_s27  ;;  %s691_s26 = sshll.u32 %s806_s4, 4  ;;  %s692_s26 = int_to_ptr.vmem [resolvable:$false] %s691_s26 }
  0x44   : > { %s693_s9 = scalar_lea.vmem %s692_s26, 2048  ;;  %p694_p0 = scmp.lt.s32.totalorder %s956_s6, %s692_s26 }
  0x45   : > { %p689_p9 = pnand %p687_p6, %p913_p2  ;;  %p695_p11 = scmp.lt.s32.totalorder %s693_s9, %s686_s27 }
  0x47   : > { %p690_p12 = pneg %p689_p9  ;;  %p696_p8 = por %p695_p11, %p694_p0 }
  0x49   : > { %p697_p10 = pnand %p696_p8, %p690_p12 }
  0x4b   : > { %700 = shalt.err (!%p697_p10)
}
  0x4c   : > { %s1170_s17 = smov 8   ;;  %s1171_s11 = smov 128  }
  0x4d   : > { %592 = dma.hbm_to_vmem [thread:$0]  (!%p890_p13), %s946_s30, 1024, %s956_s6, %s145_s7, %s1171_s11, %s1171_s11, %s1170_s17  }
  0x4e   : > { %s576_s19 = sshll.u32 %s801_s15, 8  ;;  %s190_s26 = scalar_lea.vmem [#allocation7], %s562_s5 }
  0x4f   : > { %s990_s27 = scalar_lea.hbm %s1153_s2, %s576_s19  ;;  %s197_s9 = sshll.u32 %s190_s26, 4  ;;  %s994_s9 = int_to_ptr.vmem [resolvable:$true] %s197_s9 }
  0x50   : > { %s701_s0 = scalar_lea.hbm %s990_s27, 256  ;;  %s706_s7 = scalar_lea.hbm %s1153_s2, 512 }
  0x51   : > { %p702_p11 = scmp.ne.s32.totalorder %s990_s27, %s701_s0  ;;  %p707_p3 = scmp.lt.u32.totalorder %s990_s27, %s1153_s2 }
  0x52   : > { %p708_p5 = scmp.lt.u32.totalorder %s706_s7, %s701_s0  ;;  %p710_p6 = scmp.lt.u32.totalorder %s701_s0, %s990_s27 }
  0x53   : > { %p704_p4 = pnand %p702_p11, %p913_p2 }
  0x54   : > { %p709_p7 = por %p708_p5, %p707_p3 }
  0x55   : > { %p705_p1 = pneg %p704_p4 }
  0x56   : > { %p711_p9 = por %p710_p6, %p709_p7 }
  0x58   : > { %p712_p12 = pnand %p711_p9, %p705_p1 }
  0x5a   : > { %715 = shalt.err (!%p712_p12)
}
  0x5b   : > { %s716_s25 = scalar_lea.vmem %s994_s9, 256  ;;  %s807_s5 = smov [#allocation7]  }
  0x5c   : > { %p717_p0 = scmp.ne.s32.totalorder %s994_s9, %s716_s25  ;;  %s721_s4 = sshll.u32 %s807_s5, 4  ;;  %s722_s4 = int_to_ptr.vmem [resolvable:$false] %s721_s4 }
  0x5d   : > { %s723_s26 = scalar_lea.vmem %s722_s4, 512  ;;  %p724_p11 = scmp.lt.s32.totalorder %s994_s9, %s722_s4 }
  0x5e   : > { %p719_p8 = pnand %p717_p0, %p913_p2  ;;  %p725_p4 = scmp.lt.s32.totalorder %s723_s26, %s716_s25 }
  0x60   : > { %p720_p10 = pneg %p719_p8  ;;  %p726_p3 = por %p725_p4, %p724_p11 }
  0x62   : > { %p727_p5 = pnand %p726_p3, %p720_p10 }
  0x64   : > { %730 = shalt.err (!%p727_p5)
}
  0x65   : > { %598 = dma.hbm_to_vmem [thread:$0]  (!%p890_p13), %s990_s27, 256, %s994_s9, %s907_s8, %s1171_s11, %s1171_s11, %s1170_s17  }
  0x66   : > { %p1172_p2 = scmp.ne.s32.totalorder %s1169_s29, 0 }
  0x67   : > { %s1024_s0 = sand.u32 (!%p1172_p2), 1, %s793_s13   ;;  %p1173_p1 = scmp.ne.s32.totalorder (!%p1172_p2), %s1162_s22, 0 }
  0x68   : > { %209 = sbr.rel (%p1172_p2) target bundleno = 488 (0x1e8), region = 32  ;;  %s566_s10 = sshll.u32 (!%p1172_p2), %s1024_s0, 6 }
  0x69   : > { %s212_s30 = scalar_lea.sflag (!%p1172_p2), [#allocation3], %s1024_s0  ;;  %s1028_s6 = scalar_lea.vmem (!%p1172_p2), [#allocation2], %s566_s10 }
  0x6f   : > { %776 = dma.done.wait (%p1173_p1), %s212_s30, 1024  }
  0x70   : > { %778 = vsyncadd (%p1173_p1), %s212_s30, 4294966272  ;;  %s220_s28 = sand.u32 1, %s852_s16   ;;  %s1035_s29 = scalar_lea.vmem [#allocation5], %s566_s10 }
  0x71   : > { %s221_s8 = scalar_lea.sflag [#allocation6], %s220_s28 }
  0x72   : > { %780 = dma.done.wait (%p1173_p1), %s221_s8, 1280  }
  0x73   : > { %782 = vsyncadd (%p1173_p1), %s221_s8, 4294966016  ;;  %s568_s17 = sshll.u32 %s1024_s0, 4  ;;  %vm270_vm0 = vcmask 1040384   ;;  %vm277_vm1 = vcmask 1046528   ;;  %s808_s22 = smov 1   ;;  %v344_v18 = vld [vmem:[%s1028_s6] sm:$0xff] }
  0x74   : > { %s233_s11 = scalar_lea.vmem [#allocation7], %s568_s17  ;;  %s809_s27 = smov 127   ;;  %v345_v19 = vld [vmem:[%s1028_s6 + $0x8] sm:$0xff]  ;;  %v346_v20 = vld [vmem:[%s1028_s6 + $0x10] sm:$0xff]  ;;  %v347_v21 = vld [vmem:[%s1028_s6 + $0x18] sm:$0xff]  ;;  %vm376_vm2 = vcmask 130048  }
  0x75   : > { %v266_v0 = vld [vmem:[%s233_s11] sm:$0xff]  ;;  %v267_v1 = vld [vmem:[%s233_s11 + $0x8] sm:$0xff]  ;;  %vm300_vm3 = vcmask 7168   ;;  %vm309_vm4 = vcmask 121856   ;;  %s569_s9 = sshll.u32 %s1024_s0, 3  ;;  %s571_s7 = sshll.u32 %s852_s16, 7 }
  0x76   : > { %v271_v2 = vrot.slane %v266_v0, 7  ;;  %v278_v3 = vrot.slane %v266_v0, 1  ;;  %v279_v4 = vrot.slane %v267_v1, 1  ;;  %v272_v5 = vrot.slane %v267_v1, 7  ;;  %v352_v22 = vld [vmem:[%s1035_s29] sm:$0xff]  ;;  %v353_v23 = vld [vmem:[%s1035_s29 + $0x8] sm:$0xff]  ;;  %s1107_s10 = scalar_lea.hbm %s1154_s3, %s571_s7 }
  0x77   : > { %v354_v24 = vld [vmem:[%s1035_s29 + $0x10] sm:$0xff]  ;;  %v355_v25 = vld [vmem:[%s1035_s29 + $0x18] sm:$0xff]  ;;  %v360_v26 = vsub.f32 %v344_v18, %v352_v22  ;;  %v361_v27 = vsub.f32 %v345_v19, %v353_v23  ;;  %v348_v30 = vld [vmem:[%s1028_s6 + $0x20] sm:$0xff]  ;;  %s265_s20 = scalar_lea.vmem [#allocation8], %s569_s9  ;;  %s427_s16 = scalar_lea.sflag [#allocation4], %s1024_s0 }
  0x78   : > { %v276_v6 = vsel %vm270_vm0, %v266_v0, %v271_v2  ;;  %v280_v7 = vsel %vm277_vm1, %v278_v3, %v279_v4  ;;  %v273_v8 = vsel %vm270_vm0, %v271_v2, %v272_v5  ;;  %v283_v13 = vsel %vm277_vm1, %v279_v4, %v267_v1  ;;  %v349_v31 = vld [vmem:[%s1028_s6 + $0x28] sm:$0xff]  ;;  %v356_v32 = vld [vmem:[%s1035_s29 + $0x20] sm:$0xff]  ;;  %v350_v42 = vld [vmem:[%s1028_s6 + $0x30] sm:$0xff]  ;;  %s440_s25 = sshll.u32 %s265_s20, 4  ;;  %p1174_p7 = scmp.ne.s32.totalorder %s1163_s23, 0  ;;  %s1109_s25 = int_to_ptr.vmem [resolvable:$true] %s440_s25 }
  0x79   : > { %v288_v9 = vmin.f32 %v276_v6, %v266_v0  ;;  %v284_v10 = vmax.f32 %v276_v6, %v266_v0  ;;  %v289_v11 = vmin.f32 %v273_v8, %v267_v1  ;;  %v285_v12 = vmax.f32 %v273_v8, %v267_v1  ;;  %v357_v33 = vld [vmem:[%s1035_s29 + $0x28] sm:$0xff]  ;;  %v351_v45 = vld [vmem:[%s1028_s6 + $0x38] sm:$0xff]  ;;  %v358_v46 = vld [vmem:[%s1035_s29 + $0x30] sm:$0xff]  ;;  %s731_s30 = scalar_lea.vmem %s1109_s25, 128  ;;  %s810_s6 = smov [#allocation8]  }
  0x7a   : > { %v362_v28 = vsub.f32 %v346_v20, %v354_v24  ;;  %v363_v29 = vsub.f32 %v347_v21, %v355_v25  ;;  %v368_v36 = vand.u32 2147483647, %v360_v26  ;;  %v369_v37 = vand.u32 2147483647, %v361_v27  ;;  %v359_v47 = vld [vmem:[%s1035_s29 + $0x38] sm:$0xff]  ;;  %p732_p13 = scmp.ne.s32.totalorder %s1109_s25, %s731_s30  ;;  %s735_s28 = sshll.u32 %s810_s6, 4  ;;  %s736_s28 = int_to_ptr.vmem [resolvable:$false] %s735_s28 }
  0x7b   : > { %v1042_v14 = vmin.f32 %v288_v9, %v280_v7  ;;  %v1044_v15 = vmax.f32 %v284_v10, %v280_v7  ;;  %v1048_v16 = vmin.f32 %v289_v11, %v283_v13  ;;  %v1050_v17 = vmax.f32 %v285_v12, %v283_v13  ;;  %s737_s8 = scalar_lea.vmem %s736_s28, 256  ;;  %p738_p12 = scmp.lt.s32.totalorder %s1109_s25, %s736_s28 }
  0x7c   : > { %v370_v38 = vand.u32 2147483647, %v362_v28  ;;  %v371_v39 = vand.u32 2147483647, %v363_v29  ;;  %v364_v40 = vsub.f32 %v348_v30, %v356_v32  ;;  %v365_v41 = vsub.f32 %v349_v31, %v357_v33  ;;  %p733_p6 = pnand %p732_p13, %p1174_p7  ;;  %p739_p0 = scmp.lt.s32.totalorder %s737_s8, %s731_s30 }
  0x7d   : > { %314 = vrot.lane.b32.xlu1 %v1042_v14, %s808_s22  ;;  %294 = vrot.lane.b32.xlu0 %v1044_v15, %s808_s22  ;;  %v377_v48 = vsel %vm376_vm2, %v368_v36, 0.0  ;;  %v384_v50 = vsel %vm376_vm2, %v369_v37, 0.0  ;;  %v366_v54 = vsub.f32 %v350_v42, %v358_v46  ;;  %v367_v55 = vsub.f32 %v351_v45, %v359_v47 }
  0x7e   : > { %v378_v49 = vsel %vm376_vm2, %v370_v38, 0.0  ;;  %v385_v51 = vsel %vm376_vm2, %v371_v39, 0.0  ;;  %v372_v52 = vand.u32 2147483647, %v364_v40  ;;  %v373_v53 = vand.u32 2147483647, %v365_v41  ;;  %p734_p9 = pneg %p733_p6  ;;  %p740_p8 = por %p739_p0, %p738_p12 }
  0x7f   : > { %v379_v58 = vadd.f32 %v378_v49, %v377_v48  ;;  %v386_v59 = vadd.f32 %v385_v51, %v384_v50  ;;  %v374_v4 = vand.u32 2147483647, %v366_v54  ;;  %v375_v5 = vand.u32 2147483647, %v367_v55 }
  0x80   : > { %v380_v0 = vsel %vm376_vm2, %v372_v52, 0.0  ;;  %v387_v1 = vsel %vm376_vm2, %v373_v53, 0.0  ;;  %v417_v52 = vlaneseq  ;;  %p741_p10 = pnand %p740_p8, %p734_p9 }
  0x81   : > { %316 = vrot.lane.b32.xlu1 %v1048_v16, %s808_s22  ;;  %296 = vrot.lane.b32.xlu0 %v1050_v17, %s808_s22  ;;  %v381_v18 = vadd.f32 %v380_v0, %v379_v58  ;;  %v388_v19 = vadd.f32 %v387_v1, %v386_v59  ;;  %v389_v24 = vsel %vm376_vm2, %v375_v5, 0.0 }
  0x82   : > { %v418_v53 = vshrl.u32 %v417_v52, 7 }
  0x83   : > { %v390_v29 = vadd.f32 %v389_v24, %v388_v19 }
  0x84   : > { %vm420_vm5 = vcmp.eq.s32.totalorder %v418_v53, 1  ;;  %vm419_vm6 = vcmp.eq.s32.totalorder %v418_v53, 0 }
  0x85   : > { %305 = vrot.lane.b32.xlu1 %v1050_v17, %s809_s27  ;;  %303 = vrot.lane.b32.xlu0 %v1044_v15, %s809_s27 }
  0x89   : > { %324 = vrot.lane.b32.xlu1 %v1048_v16, %s809_s27  ;;  %322 = vrot.lane.b32.xlu0 %v1042_v14, %s809_s27 }
  0xef   : > { %v315_v34 = vpop.permute.xlu1 %314  ;;  %v295_v35 = vpop.permute.xlu0 %294 }
  0xf0   : > { %v320_v60 = vsel %vm300_vm3, %v1042_v14, %v315_v34  ;;  %v301_v61 = vsel %vm300_vm3, %v1044_v15, %v295_v35 }
  0xf1   : > { %v334_v6 = vmin.f32 %v320_v60, %v1042_v14  ;;  %v330_v7 = vmax.f32 %v301_v61, %v1044_v15 }
  0xf3   : > { %v317_v43 = vpop.permute.xlu1 %316  ;;  %v297_v44 = vpop.permute.xlu0 %296 }
  0xf4   : > { %v321_v62 = vsel %vm300_vm3, %v1048_v16, %v317_v43  ;;  %v302_v63 = vsel %vm300_vm3, %v1050_v17, %v297_v44 }
  0xf5   : > { %v335_v8 = vmin.f32 %v321_v62, %v1048_v16  ;;  %v331_v9 = vmax.f32 %v302_v63, %v1050_v17 }
  0xf7   : > { %v306_v56 = vpop.permute.xlu1 %305  ;;  %v304_v57 = vpop.permute.xlu0 %303 }
  0xf8   : > { %v311_v2 = vsel %vm309_vm4, %v306_v56, %v1050_v17  ;;  %v310_v3 = vsel %vm309_vm4, %v304_v57, %v1044_v15  ;;  %v382_v15 = vsel %vm376_vm2, %v374_v4, 0.0 }
  0xf9   : > { %v333_v20 = vmax.f32 %v331_v9, %v311_v2  ;;  %v332_v21 = vmax.f32 %v330_v7, %v310_v3  ;;  %v383_v28 = vadd.f32 %v382_v15, %v381_v18 }
  0xfb   : > { %v325_v10 = vpop.permute.xlu1 %324  ;;  %v323_v11 = vpop.permute.xlu0 %322 }
  0xfc   : > { %v329_v12 = vsel %vm309_vm4, %v325_v10, %v1048_v16  ;;  %v328_v13 = vsel %vm309_vm4, %v323_v11, %v1042_v14 }
  0xfd   : > { %v337_v22 = vmin.f32 %v335_v8, %v329_v12  ;;  %v336_v23 = vmin.f32 %v334_v6, %v328_v13 }
  0xff   : > { %v339_v25 = vsub.f32 %v333_v20, %v337_v22  ;;  %v338_v17 = vsub.f32 %v332_v21, %v336_v23 }
 0x101   : > { %v340_v26 = vmax.f32 %v338_v17, 0.0  ;;  %v341_v27 = vmax.f32 %v339_v25, 0.0 }
 0x103   : > { %v342_v16 = vmin.f32 %v340_v26, 1.0  ;;  %v343_v30 = vmin.f32 %v341_v27, 1.0 }
 0x105   : > { %v405_v14 = vsel %vm376_vm2, %v342_v16, 0.0  ;;  %v406_v31 = vsel %vm376_vm2, %v343_v30, 0.0  ;;  %v391_v32 = vmul.f32 %v383_v28, %v342_v16  ;;  %v392_v33 = vmul.f32 %v390_v29, %v343_v30 }
 0x106   : > { %v407_v34 = vadd.f32 %v406_v31, %v405_v14 }
 0x107   : > { %v393_v35 = vsel %vm376_vm2, %v391_v32, 0.0  ;;  %v394_v36 = vsel %vm376_vm2, %v392_v33, 0.0 }
 0x108   : > { %408 = vadd.xlane.f32.xlu1 %v407_v34  ;;  %v395_v37 = vadd.f32 %v394_v36, %v393_v35 }
 0x10a   : > { %396 = vadd.xlane.f32.xlu0 %v395_v37 }
 0x195   : > { %v409_v38 = vpop.xlane.xlu1 %408 }
 0x196   : > { %v410_v39 = vrot.slane %v409_v38, 4 }
 0x197   : > { %v397_v40 = vpop.xlane.xlu0 %396 }
 0x198   : > { %v411_v41 = vadd.f32 %v410_v39, %v409_v38  ;;  %v398_v42 = vrot.slane %v397_v40, 4 }
 0x19a   : > { %v412_v43 = vrot.slane %v411_v41, 2  ;;  %v399_v44 = vadd.f32 %v398_v42, %v397_v40 }
 0x19c   : > { %v413_v45 = vadd.f32 %v412_v43, %v411_v41  ;;  %v400_v46 = vrot.slane %v399_v44, 2 }
 0x19e   : > { %v401_v47 = vadd.f32 %v400_v46, %v399_v44  ;;  %v414_v48 = vrot.slane %v413_v45, 1 }
 0x1a0   : > { %v402_v49 = vrot.slane %v401_v47, 1  ;;  %v415_v51 = vadd.f32 %v414_v48, %v413_v45 }
 0x1a2   : > { %v403_v50 = vadd.f32 %v402_v49, %v401_v47 }
 0x1a4   : > { %577 = vpush %v403_v50 }
 0x1a5   : > { %579 = vpush %v415_v51 }
 0x1d5   : > { %s578_s19 = spop %577 }
 0x1d6   : > { %v423_v54 = vstv %s578_s19  ;;  %s580_s5 = spop %579 }
 0x1d7   : > { %v421_v55 = vstv %s580_s5 }
 0x1d8   : > { %v422_v56 = vsel %vm420_vm5, %v421_v55, 0.0 }
 0x1d9   : > { %v424_v57 = vsel %vm419_vm6, %v423_v54, %v422_v56 }
 0x1da   : > { %425 = vst [vmem:[%s265_s20] sm:$0xff] %v424_v57 }
 0x1db   : > { %744 = shalt.err (!%p741_p10)
}
 0x1dc   : > { %s745_s0 = scalar_lea.hbm %s1107_s10, 128  ;;  %s749_s11 = scalar_lea.hbm %s1154_s3, 256 }
 0x1dd   : > { %p746_p11 = scmp.ne.s32.totalorder %s1107_s10, %s745_s0  ;;  %p750_p5 = scmp.lt.u32.totalorder %s1107_s10, %s1154_s3 }
 0x1de   : > { %p751_p2 = scmp.lt.u32.totalorder %s749_s11, %s745_s0  ;;  %p753_p13 = scmp.lt.u32.totalorder %s745_s0, %s1107_s10 }
 0x1df   : > { %p747_p4 = pnand %p746_p11, %p1174_p7 }
 0x1e0   : > { %p752_p1 = por %p751_p2, %p750_p5 }
 0x1e1   : > { %p748_p3 = pneg %p747_p4 }
 0x1e2   : > { %p754_p6 = por %p753_p13, %p752_p1 }
 0x1e4   : > { %p755_p9 = pnand %p754_p6, %p748_p3 }
 0x1e6   : > { %758 = shalt.err (!%p755_p9)
}
 0x1e7   : > { %587 = dma.vmem_to_hbm [thread:$0]  (%p1174_p7), %s1109_s25, 128, %s1107_s10, %s427_s16  }
 0x1e8 PF: > { %s452_s9 = sand.u32 1, %s789_s12   ;;  %p1175_p12 = scmp.ne.s32.totalorder %s1164_s24, 0 }
 0x1e9   : > { %p1176_p0 = scmp.ge.s32.totalorder %s801_s15, 2  ;;  %s453_s7 = scalar_lea.sflag [#allocation4], %s452_s9 }
 0x1eb   : > { %p600_p8 = pnand %p1176_p0, %p1175_p12 }
 0x1ed   : > { %784 = dma.done.wait (!%p600_p8), %s453_s7, 128  }
 0x1ee   : > { %786 = vsyncadd (!%p600_p8), %s453_s7, 4294967168  ;;  %p19_p10 = scmp.ge.s32.totalorder %s856_s18, 4   ;;  %s1177_s12 = smov %s793_s13 }
 0x1ef   : > { %s1178_s13 = smov %s797_s14  ;;  %s1179_s14 = smov %s868_s21 }
 0x1f0   : > { %s1180_s15 = smov %s856_s18  ;;  %21 = sbr.rel (!%p19_p10) target bundleno = 9 (0x9), region = 101 }
 0x1f7   :  { %458 = vsyncpa [#allocation3], 1 }
 0x1f8   :  { %460 = vsyncpa [#allocation3 + $0x1], 1 }
 0x1f9   :  { %461 = vsyncpa [#allocation6], 1 }
 0x1fa   :  { %463 = vsyncpa [#allocation6 + $0x1], 1 }
 0x1fb   :  { %464 = vsyncpa [#allocation4], 1 }
 0x1fc   :  { %466 = vsyncpa [#allocation4 + $0x1], 1 }

</bundles_post_ra>
